<compile_context>
chip_gen: v5e
topology: v5e:2x2
jax: 0.10.0
libtpu: 0.0.40
codegen_flags: <defaults>
</compile_context>

<pallas_src>
import jax
import jax.numpy as jnp
from jax.experimental import pallas as pl
from jax.experimental.pallas import tpu as pltpu


def _shortcut_kernel(x_ref, w_ref, o_ref):
    # x_ref: (1, Kdim, tm)   window-gathered, channels-first activations
    # w_ref: (Cout, Kdim)    folded (avg-pool x 1x1x1-conv) weight
    # o_ref: (1, Cout, tm)   lane-dense output block
    o_ref[0] = jnp.dot(
        w_ref[...], x_ref[0], preferred_element_type=jnp.float32
    ).astype(o_ref.dtype)


def shortcut_layer_forward(x, weight=None, *, in_channels, out_channels,
                           reduction=1, tile_m=2048,
                           vmem_budget_bytes=16 * 1024 * 1024):
    """Pallas implementation of ShortcutLayer.forward. x: (N, C, D, H, W)."""
    N, C, D, H, W = x.shape
    assert C == in_channels
    r = int(reduction)
    do_pool = r > 1
    do_conv = in_channels != out_channels

    if not do_pool and not do_conv:
        return x  # IdentityShortcut: forward is a no-op

    if do_pool:
        # NOTE: pad is derived from W%2 only but applied to BOTH H and W --
        # this mirrors the PyTorch code: padding=(0, pad, pad).
        pad = 0 if (W % 2 == 0) else 1
        Hp, Wp = H + 2 * pad, W + 2 * pad
        Ho = (Hp - r) // r + 1
        Wo = (Wp - r) // r + 1
        KK = r * r
        xp = jnp.pad(x, ((0, 0), (0, 0), (0, 0), (pad, pad), (pad, pad)))
        xp = xp[:, :, :, : Ho * r, : Wo * r]
        # (N,C,D,Ho,r,Wo,r) -> (N, r, r, C, D, Ho, Wo) -> (N, KK*C, D*Ho*Wo)
        # TODO(synk): express the r x r window gather as in-kernel strided DMA
        # (manual make_async_copy) to drop this wrapper-side transpose pass.
        xw = xp.reshape(N, C, D, Ho, r, Wo, r)
        xw = jnp.transpose(xw, (0, 4, 6, 1, 2, 3, 5))
        x_in = xw.reshape(N, KK * C, D * Ho * Wo)
    else:
        Ho, Wo = H, W
        KK = 1
        x_in = x.reshape(N, C, D * H * W)          # pure view, no extra HBM pass

    Kdim = KK * C
    Cout = out_channels if do_conv else in_channels
    Mps = D * Ho * Wo

    # Folded (pooling x conv) weight matrix, shape (Cout, Kdim):
    #   W_eff[o, kk*C + c] = w[o, c] / KK        (conv path)
    #   W_eff[c, kk*C + c] = 1 / KK              (pool-only path, in == out)
    if do_conv:
        if weight is None:
            raise ValueError("weight is required when in_channels != out_channels")
        w = weight.reshape(out_channels, in_channels).astype(jnp.float32)
    else:
        w = jnp.eye(C, dtype=jnp.float32)
    w_eff = (jnp.tile(w, (1, KK)) / float(KK)).astype(x.dtype)

    # Tile the spatial (lane) axis.  Budget the double-buffered in/out blocks
    # plus the resident weight well inside the scoped-VMEM limit on v5e/v6e/v7x.
    itemsize = x.dtype.itemsize
    tile_m = max(128, (int(tile_m) // 128) * 128)
    budget = vmem_budget_bytes - Kdim * Cout * itemsize
    bytes_per_col = 2 * (Kdim + Cout) * itemsize          # double-buffered blocks
    tm_cap = max(128, (budget // bytes_per_col) // 128 * 128)
    tm = int(min(tile_m, tm_cap))
    if Mps <= tm:
        tm = Mps          # single block: last block dim == full array dim (legal)
        grid_m = 1
    else:
        grid_m = pl.cdiv(Mps, tm)   # tm is a multiple of 128; edge block is masked

    out = pl.pallas_call(
        _shortcut_kernel,
        out_shape=jax.ShapeDtypeStruct((N, Cout, Mps), x.dtype),
        grid_spec=pltpu.PrefetchScalarGridSpec(
            num_scalar_prefetch=0,
            grid=(N, grid_m),
            in_specs=[
                pl.BlockSpec((1, Kdim, tm), lambda n, i: (n, 0, i)),
                pl.BlockSpec((Cout, Kdim), lambda n, i: (0, 0)),
            ],
            out_specs=pl.BlockSpec((1, Cout, tm), lambda n, i: (n, 0, i)),
        ),
        compiler_params=pltpu.CompilerParams(
            dimension_semantics=("parallel", "parallel"),
            vmem_limit_bytes=32 * 1024 * 1024,
        ),
    )(x_in, w_eff)

    # (N, Cout, D*Ho*Wo) -> (N, Cout, D, Ho, Wo): pure reshape, no transpose.
    return out.reshape(N, Cout, D, Ho, Wo)


def _reference(x, weight, in_channels, out_channels, reduction):
    """Pure-JAX reference mirroring the PyTorch forward."""
    if reduction > 1:
        pad = 0 if (x.shape[-1] % 2 == 0) else 1
        xp = jnp.pad(x, ((0, 0), (0, 0), (0, 0), (pad, pad), (pad, pad)))
        s = jax.lax.reduce_window(
            xp, 0.0, jax.lax.add,
            window_dimensions=(1, 1, 1, reduction, reduction),
            window_strides=(1, 1, 1, reduction, reduction),
            padding="VALID")
        x = s / float(reduction * reduction)   # count_include_pad=True
    if in_channels != out_channels:
        w = weight.reshape(out_channels, in_channels)
        x = jnp.einsum("ncdhw,oc->nodhw", x, w,
                       precision=jax.lax.Precision.HIGHEST)
    return x


if __name__ == "__main__":
    key = jax.random.PRNGKey(0)

    def _check(name, N, Cin, Cout, D, H, W, reduction, k):
        kx, kw = jax.random.split(k)
        x = jax.random.normal(kx, (N, Cin, D, H, W), dtype=jnp.float32)
        weight = None
        if Cin != Cout:
            # Conv3d(in, out, 1, 1, bias=False) weight: (Cout, Cin, 1, 1, 1)
            weight = jax.random.normal(kw, (Cout, Cin, 1, 1, 1),
                                       dtype=jnp.float32) * 0.1
        y = shortcut_layer_forward(x, weight, in_channels=Cin, out_channels=Cout,
                                   reduction=reduction)
        y = jax.block_until_ready(y)
        y_ref = _reference(x, weight, Cin, Cout, reduction)
        assert y.shape == y_ref.shape, (name, y.shape, y_ref.shape)
        err = float(jnp.max(jnp.abs(y - y_ref)))
        assert jnp.allclose(y, y_ref, atol=1e-4, rtol=1e-4), (name, err)

    k0, k1, k2 = jax.random.split(key, 3)
    # Main config: ShortcutLayer(in=4, out=8, reduction=2) on (2, 4, 3, 16, 16)
    _check("pool_and_conv", 2, 4, 8, 3, 16, 16, 2, k0)
    # Conv-only path (reduction == 1, in != out): zero wrapper-side relayouts.
    _check("conv_only", 2, 4, 8, 3, 16, 16, 1, k1)
    # Pool-only path (in == out, reduction > 1) with odd W -> padding branch.
    _check("pool_only", 2, 4, 4, 3, 15, 15, 2, k2)

    print("KERNEL_OK")
</pallas_src>

<mosaic_0001>
module attributes {stable_mosaic.version = 11 : i64} {
  func.func @_shortcut_kernel(%arg0: i32, %arg1: i32, %arg2: memref<1x16x192xf32, #tpu.memory_space<vmem>>, %arg3: memref<8x16xf32, #tpu.memory_space<vmem>>, %arg4: memref<1x8x192xf32, #tpu.memory_space<vmem>>) attributes {dimension_semantics = [#tpu.dimension_semantics<parallel>, #tpu.dimension_semantics<parallel>], iteration_bounds = array<i64: 2, 1>, scalar_prefetch = 0 : i64, scratch_operands = 0 : i64, tpu.core_type = #tpu.core_type<tc>, window_params = [{transform_indices = @transform_0, window_bounds = array<i64: 1, 16, 192>}, {pipeline_mode = #tpu.pipeline_mode<synchronous>, transform_indices = @transform_1, window_bounds = array<i64: 8, 16>}, {transform_indices = @transform_2, window_bounds = array<i64: 1, 8, 192>}]} {
    %c0 = arith.constant 0 : index
    %c0_0 = arith.constant 0 : index
    %0 = vector.load %arg3[%c0, %c0_0] : memref<8x16xf32, #tpu.memory_space<vmem>>, vector<8x16xf32>
    %c0_1 = arith.constant 0 : index
    %c0_2 = arith.constant 0 : index
    %c0_3 = arith.constant 0 : index
    %1 = vector.load %arg2[%c0_1, %c0_2, %c0_3] : memref<1x16x192xf32, #tpu.memory_space<vmem>>, vector<1x16x192xf32>
    %2 = vector.shape_cast %1 : vector<1x16x192xf32> to vector<16x192xf32>
    %cst = arith.constant dense<0.000000e+00> : vector<8x192xf32>
    %3 = tpu.matmul %0, %2, %cst {dimension_numbers = #tpu.dot_dimension_numbers<[1], [0], [0], [1], [0, 0, 1, 1], [], []>} : vector<8x16xf32>, vector<16x192xf32>, vector<8x192xf32> -> vector<8x192xf32>
    %c0_4 = arith.constant 0 : index
    %c0_5 = arith.constant 0 : index
    %c0_6 = arith.constant 0 : index
    %4 = vector.load %arg4[%c0_4, %c0_5, %c0_6] : memref<1x8x192xf32, #tpu.memory_space<vmem>>, vector<1x8x192xf32>
    %5 = vector.shape_cast %4 : vector<1x8x192xf32> to vector<8x192xf32>
    %6 = vector.shape_cast %3 : vector<8x192xf32> to vector<1x8x192xf32>
    tpu.vector_store %arg4[%c0_4, %c0_5, %c0_6], %6 {strides = array<i32>} : memref<1x8x192xf32, #tpu.memory_space<vmem>>, vector<1x8x192xf32>,
    return
  }
  func.func @transform_0(%arg0: i32, %arg1: i32) -> (i32, i32, i32) {
    %c0_i32 = arith.constant 0 : i32
    %c0_i32_0 = arith.constant 0 : i32
    return %arg0, %c0_i32, %arg1 : i32, i32, i32
  }
  func.func @transform_1(%arg0: i32, %arg1: i32) -> (i32, i32) {
    %c0_i32 = arith.constant 0 : i32
    %c0_i32_0 = arith.constant 0 : i32
    %c0_i32_1 = arith.constant 0 : i32
    return %c0_i32, %c0_i32_0 : i32, i32
  }
  func.func @transform_2(%arg0: i32, %arg1: i32) -> (i32, i32, i32) {
    %c0_i32 = arith.constant 0 : i32
    %c0_i32_0 = arith.constant 0 : i32
    return %arg0, %c0_i32, %arg1 : i32, i32, i32
  }
}

</mosaic_0001>

<bundles_post_ra>
// kernel: tpu_custom_call.1
= control target key start
LH: loop header
LB: loop body
LE: loop exit
PB: predicated region body
PF: predicated region fallthrough
CT: control target
= control target key end

     0   :  { %7 = vsyncpa [#allocation3], 0  ;;  %s778_s0 = inlined_call_operand.hbm [shape: f32[2,16,192], index: 0, kind: input, shape index: {}]   ;;  %s779_s1 = inlined_call_operand.hbm [shape: f32[8,16], index: 1, kind: input, shape index: {}]   ;;  %s780_s2 = inlined_call_operand.hbm [shape: f32[2,8,192], index: 2, kind: output, shape index: {}]  }
   0x1   :  { %9 = vsyncpa [#allocation3 + $0x1], 0 }
   0x2   :  { %10 = vsyncpa [#allocation6], 0 }
   0x3   :  { %11 = vsyncpa [#allocation4], 0 }
   0x4   :  { %13 = vsyncpa [#allocation4 + $0x1], 0  ;;  %s626_s9 = smov 0   ;;  %s628_s10 = smov 0  }
   0x5   :  { %s630_s11 = smov 0   ;;  %s632_s12 = smov 0  }
   0x6   :  { %s634_s13 = smov 0   ;;  %s636_s14 = smov 0  }
   0x7 LB: > { %s364_s15 = sadd.s32 4294967295, %s606_s14   ;;  %s365_s16 = sadd.s32 4294967294, %s606_s14   ;;  %s606_s14 = sphi %s636_s14, %s19_s14   ;;  %s602_s13 = sphi %s634_s13, %s792_s13   ;;  %s598_s12 = sphi %s632_s12, %s791_s12   ;;  %s594_s11 = sphi %s630_s11, %s790_s11   ;;  %s590_s10 = sphi %s628_s10, %s789_s10   ;;  %s586_s9 = sphi %s626_s9, %s788_s9  }
   0x8   : > { %s40_s17 = sadd.s32 1, %s594_s11  ;;  %p47_p0 = scmp.ne.s32.totalorder %s594_s11, %s590_s10 }
   0x9   : > { %p48_p1 = scmp.eq.s32.totalorder %s606_s14, 0  ;;  %p53_p2 = scmp.ne.s32.totalorder %s590_s10, %s586_s9 }
   0xa   : > { %p664_p3 = scmp.eq.s32.totalorder %s364_s15, 0  ;;  %p100_p4 = scmp.eq.s32.totalorder %s364_s15, 1 }
   0xb   : > { %p668_p5 = por %p48_p1, %p47_p0  ;;  %p106_p6 = scmp.eq.s32.totalorder %s365_s16, 1 }
   0xc   : > { %p674_p7 = por %p664_p3, %p53_p2  ;;  %p678_p8 = por %p100_p4, %p47_p0 }
   0xd   : > { %p682_p9 = por %p106_p6, %p53_p2  ;;  %p366_p10 = scmp.ge.s32.totalorder %s606_s14, 1 }
   0xe   : > { %p113_p11 = scmp.lt.s32.totalorder %s606_s14, 3  ;;  %s125_s25 = sshll.u32 %s779_s1, 4  ;;  %s126_s25 = int_to_ptr.hbm [resolvable:$true] %s125_s25 }
   0xf   : > { %s608_s27 = smov [#allocation5]   ;;  %p368_p13 = scmp.ge.s32.totalorder %s606_s14, 2 }
  0x10   : > { %p691_p12 = pnand %p366_p10, %p113_p11  ;;  %s127_s28 = sshll.u32 %s608_s27, 4  ;;  %s128_s28 = int_to_ptr.vmem [resolvable:$true] %s127_s28 }
  0x11   : > { %p406_p1 = scmp.lt.s32.totalorder %s606_s14, 2  ;;  %s31_s30 = sadd.s32 1, %s602_s13 }
  0x12   : > { %p393_p0 = pneg %p691_p12  ;;  %p33_p6 = scmp.ge.s32.totalorder %s31_s30, 2 }
  0x13   : > { %p703_p4 = pnand %p406_p1, %p668_p5  ;;  %s138_s3 = sand.u32 1, %s594_s11  }
  0x14   : > { %p394_p2 = pnand %p393_p0, %p664_p3  ;;  %s794_s30 = smov (%p33_p6, %s31_s30), 0 }
  0x15   : > { %s369_s4 = sshll.u32 %s138_s3, 5  ;;  %s35_s5 = ssub.s32 %s602_s13, %s794_s30 }
  0x16   : > { %396 = dma.hbm_to_vmem [thread:$0]  (!%p394_p2), %s126_s25, 128, %s128_s28, [#allocation6]  }
  0x17   : > { %p38_p10 = scmp.eq.s32.totalorder %s35_s5, 0  ;;  %s383_s6 = sshll.u32 %s602_s13, 5 }
  0x18   : > { %s149_s15 = scalar_lea.hbm %s778_s0, %s383_s6  ;;  %s142_s16 = scalar_lea.vmem [#allocation2], %s369_s4 }
  0x19   : > { %s152_s19 = sshll.u32 %s142_s16, 4  ;;  %s150_s24 = sshll.u32 %s149_s15, 4  ;;  %s153_s19 = int_to_ptr.vmem [resolvable:$true] %s152_s19  ;;  %s151_s24 = int_to_ptr.hbm [resolvable:$true] %s150_s24 }
  0x1a   : > { %s720_s23 = scalar_select %p38_p10, %s594_s11, %s40_s17  }
  0x1b   : > { %s139_s25 = scalar_lea.sflag [#allocation3], %s138_s3  ;;  %s609_s27 = smov 256  }
  0x1c   : > { %s610_s28 = smov 16   ;;  %164 = sbr.rel (%p691_p12) target bundleno = 170 (0xaa), region = 28 }
  0x1d   : > { %400 = dma.hbm_to_vmem [thread:$0]  (!%p703_p4), %s151_s24, 512, %s153_s19, %s139_s25, %s609_s27, %s609_s27, %s610_s28  }
  0x1e   : > { %s727_s5 = sand.u32 (!%p691_p12), 1, %s590_s10  }
  0x1f   : > { %s373_s4 = sshll.u32 (!%p691_p12), %s727_s5, 5  ;;  %s167_s17 = scalar_lea.sflag (!%p691_p12), [#allocation3], %s727_s5 }
  0x20   : > { %s170_s6 = scalar_lea.vmem (!%p691_p12), [#allocation2], %s373_s4 }
  0x21   : > { %573 = dma.done.wait (%p674_p7), %s167_s17, 512  }
  0x22   : > { %575 = vsyncadd (%p674_p7), %s167_s17, 4294966784 }
  0x23   : > { %577 = dma.done.wait (%p664_p3), [#allocation6], 128  }
  0x24   : > { %579 = vsyncadd (%p664_p3), [#allocation6], 4294967168  ;;  %v202_v0 = vld [vmem:[%s170_s6 + $0x10] sm:$0xff]  ;;  %v203_v1 = vld [vmem:[%s170_s6 + $0x18] sm:$0xff]  ;;  %vm204_vm0 = vcmask 130048   ;;  %s375_s20 = sshll.u32 %s727_s5, 4 }
  0x25   : > { %v200_v2 = vld [vmem:[%s170_s6] sm:$0xff]  ;;  %222 = vmatpush.msra.mxu0 %v202_v0  ;;  %242 = vmatpush.msra.mxu1 %v203_v1  ;;  %v201_v3 = vld [vmem:[%s170_s6 + $0x8] sm:$0xff]  ;;  %s384_s26 = sshll.u32 %s598_s12, 4  ;;  %s196_s7 = scalar_lea.vmem [#allocation7], %s375_s20  ;;  %vm249_vm1 = vcmask 523264  }
  0x26   : > { %v199_v4 = vld [vmem:[#allocation5] sm:$0xff]  ;;  %s265_s3 = scalar_lea.hbm %s780_s2, %s384_s26  ;;  %s267_s8 = sshll.u32 %s196_s7, 4  ;;  %s268_s8 = int_to_ptr.vmem [resolvable:$true] %s267_s8 }
  0x27   : > { %223 = vmatpush.msra.mxu0 %v200_v2  ;;  %243 = vmatpush.msra.mxu1 %v201_v3  ;;  %s269_s15 = sshll.u32 %s265_s3, 4  ;;  %s252_s16 = scalar_lea.sflag [#allocation4], %s727_s5  ;;  %s270_s15 = int_to_ptr.hbm [resolvable:$true] %s269_s15 }
  0x28   : > { %376 = vmatmul.msk.f32.vlgmr.msra.gmra.mxu0 %vm204_vm0, %v199_v4  ;;  %377 = vmatmul.msk.f32.vlgmr.msra.gmra.mxu1 %vm204_vm0, %v199_v4  ;;  %s534_s19 = sshra.s32 %s270_s15, 4  ;;  %s540_s27 = scalar_lea.hbm %s780_s2, 32  ;;  %s535_s19 = int_to_ptr.hbm [resolvable:$true] %s534_s19 }
  0x29   : > { %s536_s24 = scalar_lea.hbm %s535_s19, 16  ;;  %p541_p11 = scmp.lt.s32.totalorder %s535_s19, %s780_s2 }
  0x2a   : > { %p537_p3 = scmp.ne.s32.totalorder %s535_s19, %s536_s24  ;;  %p542_p12 = scmp.lt.s32.totalorder %s540_s27, %s536_s24 }
  0x2c   : > { %p538_p5 = pnand %p537_p3, %p678_p8  ;;  %p543_p0 = por %p542_p12, %p541_p11 }
  0x2e   : > { %p539_p7 = pneg %p538_p5 }
  0x30   : > { %p544_p1 = pnand %p543_p0, %p539_p7 }
  0xa5   : > { %v225_v5 = vpop.f32.mrf.mxu0  ;;  %v245_v6 = vpop.f32.mrf.mxu1 }
  0xa6   : > { %248 = vst [vmem:[%s196_s7] sm:$0xff] %v225_v5 }
  0xa7   : > { %250 = vst.msk [vmem:[%s196_s7 + $0x8] sm:$0xff] %vm249_vm1, %v245_v6 }
  0xa8   : > { %547 = shalt.err (!%p544_p1)
}
  0xa9   : > { %391 = dma.vmem_to_hbm [thread:$0]  (%p678_p8), %s268_s8, 256, %s270_s15, %s252_s16  }
  0xaa PF: > { %s281_s5 = sand.u32 1, %s586_s9   ;;  %p402_p2 = pnand %p368_p13, %p682_p9 }
  0xab   : > { %s282_s17 = scalar_lea.sflag [#allocation4], %s281_s5 }
  0xac   : > { %p403_p4 = pneg %p402_p2 }
  0xae   : > { %581 = dma.done.wait (%p403_p4), %s282_s17, 256  }
  0xaf   : > { %583 = vsyncadd (%p403_p4), %s282_s17, 4294967040  ;;  %s19_s14 = sadd.s32 1, %s606_s14   ;;  %s788_s9 = smov %s590_s10 }
  0xb0   : > { %p16_p6 = scmp.ge.s32.totalorder %s19_s14, 4   ;;  %s789_s10 = smov %s594_s11 }
  0xb1   : > { %s790_s11 = smov %s720_s23  ;;  %s791_s12 = smov %s602_s13 }
  0xb2   : > { %s792_s13 = smov %s794_s30  ;;  %18 = sbr.rel (!%p16_p6) target bundleno = 7 (0x7), region = 77 }
  0xb7   :  { %288 = vsyncpa [#allocation3], 1 }
  0xb8   :  { %290 = vsyncpa [#allocation3 + $0x1], 1 }
  0xb9   :  { %291 = vsyncpa [#allocation6], 1 }
  0xba   :  { %292 = vsyncpa [#allocation4], 1 }
  0xbb   :  { %294 = vsyncpa [#allocation4 + $0x1], 1 }

</bundles_post_ra>
